<compile_context>
chip_gen: v7x
topology: tpu7x:2x2x1
jax: 0.10.0
libtpu: 0.0.40
codegen_flags: <defaults>
</compile_context>

<pallas_src>
import jax
import jax.numpy as jnp
from jax.experimental import pallas as pl
from jax.experimental.pallas import tpu as pltpu


def _round_up(x, m):
    return (x + m - 1) // m * m


def _cdiv(a, b):
    return (a + b - 1) // b


# -----------------------------------------------------------------------------
# Pallas kernel: out = act @ W_cat + b_fold        (single folded contraction)
#   act   : (tm, Ht+Hi)  bf16
#   W_cat : (Ht+Hi, Cp)  bf16   (VMEM-resident, index_map pinned to (0, 0))
#   b     : (1, Cp)      f32
#   out   : (tm, Cp)     bf16   (lane-dense, unmasked stores)
# -----------------------------------------------------------------------------
def _fused_head_kernel(act_ref, w_ref, b_ref, out_ref):
    acc = jnp.dot(act_ref[...], w_ref[...], preferred_element_type=jnp.float32)
    out_ref[...] = (acc + b_ref[...]).astype(out_ref.dtype)


def fuse_and_classify(text_pool, image_pool, w_align, b_align, w_clf, b_clf,
                      *, batch_tile=4096, compute_dtype=jnp.bfloat16):
    """Fused align + residual-add + classifier head in one Pallas call."""
    B, text_hidden = text_pool.shape
    image_hidden = image_pool.shape[1]
    num_classes = w_clf.shape[1]
    K = text_hidden + image_hidden

    # ---- trace-time weight fold (f32, exact up to a single bf16 rounding) ----
    w_clf_f32 = w_clf.astype(jnp.float32)
    w_fold_img = w_align.astype(jnp.float32) @ w_clf_f32                # (Hi, C)
    b_fold = b_align.astype(jnp.float32) @ w_clf_f32 + b_clf.astype(jnp.float32)

    # Single concatenated weight: logits = [text, image] @ [[Wc], [Wa@Wc]] + b
    w_cat = jnp.concatenate([w_clf_f32, w_fold_img], axis=0)           # (K, C)

    # ---- lane/sublane padding for dense tiles & unmasked stores ----
    cp = _round_up(num_classes, 128)                                    # lane-dense output
    w_p = jnp.pad(w_cat.astype(compute_dtype), ((0, 0), (0, cp - num_classes)))
    b_p = jnp.pad(b_fold, (0, cp - num_classes)).reshape(1, cp)         # (1, Cp) f32

    # Single bf16 activation slab (B, K); fuses with the encoder tail under jit.
    act = jnp.concatenate([text_pool.astype(compute_dtype),
                           image_pool.astype(compute_dtype)], axis=1)   # (B, K)

    # ---- batch tiling: big tiles, multiple of 16, minimal tail padding ----
    bp = _round_up(max(B, 1), 16)
    tm_max = max(16, _round_up(min(int(batch_tile), bp), 16))
    num_tiles = _cdiv(bp, tm_max)
    # Keep at least two grid steps when there is enough work so both v7x
    # TensorCores contribute HBM bandwidth.
    if num_tiles == 1 and bp >= 256:
        num_tiles = 2
    tm = _round_up(_cdiv(bp, num_tiles), 16)   # even tiles -> last tile mostly full
    bp = num_tiles * tm

    act_p = jnp.pad(act, ((0, bp - B), (0, 0)))                         # (Bp, K) bf16

    # ---- VMEM budget derived from the actual footprint (double-buffered) ----
    per_step_bytes = (
        2 * (tm * K * 2)          # activation tile, bf16, double-buffered
        + 2 * (tm * cp * 2)       # output tile, bf16, double-buffered
        + 2 * (K * cp * 2)        # resident weight (conservatively x2)
        + 2 * (cp * 4)            # bias (f32)
    )
    vmem_limit = min(max(per_step_bytes + (4 << 20), 16 << 20), 48 << 20)

    grid = (num_tiles,)
    out_padded = pl.pallas_call(
        _fused_head_kernel,
        out_shape=jax.ShapeDtypeStruct((bp, cp), compute_dtype),
        grid_spec=pltpu.PrefetchScalarGridSpec(
            num_scalar_prefetch=0,
            grid=grid,
            in_specs=[
                pl.BlockSpec((tm, K), lambda i: (i, 0)),     # activation tile
                pl.BlockSpec((K, cp), lambda i: (0, 0)),     # VMEM-resident weight
                pl.BlockSpec((1, cp), lambda i: (0, 0)),     # folded bias (f32)
            ],
            out_specs=pl.BlockSpec((tm, cp), lambda i: (i, 0)),
        ),
        compiler_params=pltpu.CompilerParams(
            dimension_semantics=("parallel",),
            vmem_limit_bytes=vmem_limit,
        ),
    )(act_p, w_p, b_p)

    # Slice away class/batch padding immediately (padded columns are not valid
    # logits); cast back to f32 to match the module's output dtype.
    return out_padded[:B, :num_classes].astype(jnp.float32)


# -----------------------------------------------------------------------------
# Deterministic stand-in encoders (plain JAX glue).
# TODO(synk): TextEncoder / ImageEncoder backbones are external to this module;
# they are replaced by deterministic pool-then-project stand-ins here.
# -----------------------------------------------------------------------------
def text_encoder(text_inputs, w_text):
    # Pool-then-project: mean and the linear projection commute, so the
    # (B, S, Ht) last_hidden tensor is never materialized.
    pooled = jnp.mean(text_inputs, axis=1)        # (B, D)
    return jnp.tanh(pooled @ w_text)              # (B, Ht)


def image_encoder(image_inputs, w_img):
    gap = jnp.mean(image_inputs, axis=(2, 3))     # NCHW -> (B, C)
    return jnp.tanh(gap @ w_img)                  # (B, Hi)


# -----------------------------------------------------------------------------
# Full CombineModel forward
# -----------------------------------------------------------------------------
@jax.jit
def combine_model_forward(text_inputs, image_inputs, params):
    text_pool = text_encoder(text_inputs, params["w_text"])
    image_pool = image_encoder(image_inputs, params["w_img"])
    # image_pooler_output.view(-1, hidden) is a no-op for a 2-D pooler output.
    return fuse_and_classify(
        text_pool, image_pool,
        params["w_align"], params["b_align"],
        params["w_clf"], params["b_clf"],
    )


# -----------------------------------------------------------------------------
# Pure-JAX f32 reference (unfolded module semantics) for correctness check
# -----------------------------------------------------------------------------
def reference_forward(text_inputs, image_inputs, params):
    text_pool = text_encoder(text_inputs, params["w_text"])
    image_pool = image_encoder(image_inputs, params["w_img"])
    aligned = image_pool @ params["w_align"] + params["b_align"]
    fused = text_pool + aligned
    return fused @ params["w_clf"] + params["b_clf"]


if __name__ == "__main__":
    # small, deterministic shapes
    B, S, D_TEXT = 2, 8, 32      # text: batch, seq, token-feature dim
    C_IMG, H_IMG, W_IMG = 4, 16, 16
    TEXT_HIDDEN = 32             # text_encoder.hidden_size
    IMAGE_HIDDEN = 64            # config.image_model_hidden_sizes[...]
    NUM_CLASSES = 8

    key = jax.random.PRNGKey(0)
    keys = jax.random.split(key, 8)

    text_inputs = jax.random.normal(keys[0], (B, S, D_TEXT), dtype=jnp.float32)
    image_inputs = jax.random.normal(keys[1], (B, C_IMG, H_IMG, W_IMG), dtype=jnp.float32)

    params = {
        # stand-in encoder projections
        "w_text": jax.random.normal(keys[2], (D_TEXT, TEXT_HIDDEN), jnp.float32) * 0.05,
        "w_img": jax.random.normal(keys[3], (C_IMG, IMAGE_HIDDEN), jnp.float32) * 0.05,
        # align: nn.Linear(image_hidden, text_hidden)
        "w_align": jax.random.normal(keys[4], (IMAGE_HIDDEN, TEXT_HIDDEN), jnp.float32) * 0.05,
        "b_align": jax.random.normal(keys[5], (TEXT_HIDDEN,), jnp.float32) * 0.01,
        # classifier: nn.Linear(text_hidden, num_classes)
        "w_clf": jax.random.normal(keys[6], (TEXT_HIDDEN, NUM_CLASSES), jnp.float32) * 0.05,
        "b_clf": jax.random.normal(keys[7], (NUM_CLASSES,), jnp.float32) * 0.01,
    }

    logits = combine_model_forward(text_inputs, image_inputs, params)
    logits = jax.block_until_ready(logits)

    ref = reference_forward(text_inputs, image_inputs, params)
    assert logits.shape == (B, NUM_CLASSES)
    # bf16 MXU operands + bf16 output store + folded weights -> loosened tolerance.
    assert jnp.allclose(logits, ref, atol=1e-2, rtol=1e-2), "mismatch vs reference"

    print("KERNEL_OK")
</pallas_src>

<mosaic_0001>
module attributes {stable_mosaic.version = 11 : i64} {
  func.func @_fused_head_kernel(%arg0: i32, %arg1: memref<16x96xbf16, #tpu.memory_space<vmem>>, %arg2: memref<96x128xbf16, #tpu.memory_space<vmem>>, %arg3: memref<1x128xf32, #tpu.memory_space<vmem>>, %arg4: memref<16x128xbf16, #tpu.memory_space<vmem>>) attributes {dimension_semantics = [#tpu.dimension_semantics<parallel>], iteration_bounds = array<i64: 1>, scalar_prefetch = 0 : i64, scratch_operands = 0 : i64, tpu.core_type = #tpu.core_type<tc>, window_params = [{transform_indices = @transform_0, window_bounds = array<i64: 16, 96>}, {pipeline_mode = #tpu.pipeline_mode<synchronous>, transform_indices = @transform_1, window_bounds = array<i64: 96, 128>}, {pipeline_mode = #tpu.pipeline_mode<synchronous>, transform_indices = @transform_2, window_bounds = array<i64: 1, 128>}, {transform_indices = @transform_3, window_bounds = array<i64: 16, 128>}]} {
    %c0 = arith.constant 0 : index
    %c0_0 = arith.constant 0 : index
    %0 = vector.load %arg1[%c0, %c0_0] : memref<16x96xbf16, #tpu.memory_space<vmem>>, vector<16x96xbf16>
    %c0_1 = arith.constant 0 : index
    %c0_2 = arith.constant 0 : index
    %1 = vector.load %arg2[%c0_1, %c0_2] : memref<96x128xbf16, #tpu.memory_space<vmem>>, vector<96x128xbf16>
    %cst = arith.constant dense<0.000000e+00> : vector<16x128xf32>
    %2 = tpu.matmul %0, %1, %cst {dimension_numbers = #tpu.dot_dimension_numbers<[1], [0], [0], [1], [0, 0, 1, 1], [], []>} : vector<16x96xbf16>, vector<96x128xbf16>, vector<16x128xf32> -> vector<16x128xf32>
    %c0_3 = arith.constant 0 : index
    %c0_4 = arith.constant 0 : index
    %3 = vector.load %arg3[%c0_3, %c0_4] : memref<1x128xf32, #tpu.memory_space<vmem>>, vector<1x128xf32>
    %4 = vector.broadcast %3 : vector<1x128xf32> to vector<16x128xf32>
    %5 = arith.addf %2, %4 : vector<16x128xf32>
    %6 = arith.truncf %5 : vector<16x128xf32> to vector<16x128xbf16>
    %c0_5 = arith.constant 0 : index
    %c0_6 = arith.constant 0 : index
    %7 = vector.load %arg4[%c0_5, %c0_6] : memref<16x128xbf16, #tpu.memory_space<vmem>>, vector<16x128xbf16>
    tpu.vector_store %arg4[%c0_5, %c0_6], %6 {strides = array<i32>} : memref<16x128xbf16, #tpu.memory_space<vmem>>, vector<16x128xbf16>,
    return
  }
  func.func @transform_0(%arg0: i32) -> (i32, i32) {
    %c0_i32 = arith.constant 0 : i32
    %c0_i32_0 = arith.constant 0 : i32
    return %arg0, %c0_i32 : i32, i32
  }
  func.func @transform_1(%arg0: i32) -> (i32, i32) {
    %c0_i32 = arith.constant 0 : i32
    %c0_i32_0 = arith.constant 0 : i32
    %c0_i32_1 = arith.constant 0 : i32
    return %c0_i32, %c0_i32_0 : i32, i32
  }
  func.func @transform_2(%arg0: i32) -> (i32, i32) {
    %c0_i32 = arith.constant 0 : i32
    %c0_i32_0 = arith.constant 0 : i32
    %c0_i32_1 = arith.constant 0 : i32
    return %c0_i32, %c0_i32_0 : i32, i32
  }
  func.func @transform_3(%arg0: i32) -> (i32, i32) {
    %c0_i32 = arith.constant 0 : i32
    %c0_i32_0 = arith.constant 0 : i32
    return %arg0, %c0_i32 : i32, i32
  }
}

</mosaic_0001>

<bundles_post_ra>
// kernel: combine_model_forward.1
= control target key start
LH: loop header
LB: loop body
LE: loop exit
PB: predicated region body
PF: predicated region fallthrough
CT: control target
= control target key end

     0   :  { %v186_v0 = vmov 0.0   ;;  %vm187_vm0 = vmmov 0   ;;  %vm77_vm1 = vcmask 785408   ;;  %s235_s1 = inlined_call_operand.vmem [shape: bf16[96,128], index: 1, kind: input, shape index: {}]   ;;  %s236_s0 = inlined_call_operand.vmem [shape: bf16[16,96], index: 0, kind: input, shape index: {}]   ;;  %s237_s2 = inlined_call_operand.vmem [shape: f32[1,128], index: 2, kind: input, shape index: {}]   ;;  %s238_s3 = inlined_call_operand.vmem [shape: bf16[16,128], index: 3, kind: output, shape index: {}]  }
   0x1   :  { %161 = vmatprep.subr.bf16.mxu0 %v186_v0  ;;  %v179_v1 = vld [vmem:[%s235_s1] sm:$0xff]   ;;  %173 = vmatprep.mubr.msk.bf16.mxu0 %vm187_vm0, %v186_v0  ;;  %v180_v2 = vld [vmem:[%s235_s1 + $0x8] sm:$0xff]   ;;  %v181_v3 = vld [vmem:[%s235_s1 + $0x10] sm:$0xff]  }
   0x2   :  { %162 = vmatpush3.bf16.msra.mxu0 %v179_v1  ;;  %v182_v4 = vld [vmem:[%s235_s1 + $0x18] sm:$0xff]   ;;  %v183_v5 = vld [vmem:[%s235_s1 + $0x20] sm:$0xff]   ;;  %v184_v6 = vld [vmem:[%s235_s1 + $0x28] sm:$0xff]  }
   0x3   :  { %163 = vmatprep.subr.bf16.mxu0 %v186_v0  ;;  %v185_v7 = vld [vmem:[%s236_s0] sm:$0xff]  }
   0x4   :  { %v136_v8 = vld [vmem:[%s237_s2] ss:$0 sm:$0xff] }
   0x6   :  { %164 = vmatpush3.bf16.msra.mxu0 %v180_v2 }
   0x7   :  { %165 = vmatprep.subr.bf16.mxu0 %v186_v0 }
   0xa   :  { %166 = vmatpush3.bf16.msra.mxu0 %v181_v3 }
   0xb   :  { %167 = vmatprep.subr.bf16.mxu0 %v186_v0 }
   0xe   :  { %168 = vmatpush3.bf16.msra.mxu0 %v182_v4 }
   0xf   :  { %169 = vmatprep.subr.bf16.mxu0 %v186_v0 }
  0x12   :  { %170 = vmatpush3.bf16.msra.mxu0 %v183_v5 }
  0x13   :  { %171 = vmatprep.subr.bf16.mxu0 %v186_v0 }
  0x16   :  { %172 = vmatpush3.bf16.msra.mxu0 %v184_v6 }
  0x19   :  { %174 = vmatmul.mubr.msk.bf16.vlgmr.msra.gmra.mrb[0].mxu0 %vm77_vm1, %v185_v7 }
  0xec   :  { %v115_v9 = vpop.f32.mrb[0].mxu0 }
  0xed   :  { %v175_v10 = vpop.f32.mrb[1].mxu0  ;;  %v116_v12 = vadd.f32 %v136_v8, %v115_v9 }
  0xee   :  { %v118_v11 = vpop.f32.mrb[2].mxu0 }
  0xef   :  { %v119_v13 = vadd.f32 %v136_v8, %v118_v11  ;;  %v176_v14 = vpop.f32.mrb[3].mxu0 }
  0xf1   :  { %v152_v15 = vpack.c.bf16 %v119_v13, %v116_v12 }
  0xf3   :  { %153 = vst [vmem:[%s238_s3] sm:$0xff] %v152_v15  }

</bundles_post_ra>
